<compile_context>
chip_gen: v7x
topology: tpu7x:2x2x1
jax: 0.10.0
libtpu: 0.0.40
codegen_flags: <defaults>
</compile_context>

<pallas_src>
import functools

import jax
import jax.numpy as jnp
from jax import lax
from jax.experimental import pallas as pl
from jax.experimental.pallas import tpu as pltpu

EPS = 1e-5       # PyTorch BatchNorm2d default
LANE = 128       # TPU lane width
SUBL = 16        # bf16 sublane packing granularity


# ------------------------------- helpers ------------------------------------

def _round_up(x, m):
    return (x + m - 1) // m * m


def _pad2d(a, rows, cols, dtype=None):
    r, c = a.shape
    out = jnp.pad(a, ((0, rows - r), (0, cols - c)))
    return out.astype(dtype) if dtype is not None else out


def _vmem_capacity():
    """Physical VMEM per TensorCore (generation-aware; 64 MiB on v7x)."""
    try:
        return int(pltpu.get_tpu_info().vmem_capacity_bytes)
    except Exception:            # query unavailable -> assume 128 MiB part
        return 128 << 20


def _conv_tile_bytes(tile_m, kp, ct):
    # double-buffered bf16 patch tile + double-buffered bf16 y tile
    # + (double-buffered) bf16 weight + gamma/beta/(scale,shift)/stats slack.
    return 2 * tile_m * kp * 2 + 2 * tile_m * ct * 2 + 2 * kp * ct * 2 + 64 * ct * 4


def _ew_tile_bytes(tile_m, cp, n_big):
    # pass-2 elementwise sweep: n_big double-buffered (tile_m, cp) streams.
    return n_big * 2 * tile_m * cp * 4 + 16 * cp * 4


def _shrink_tile(cap, bytes_fn, budget):
    t = cap
    while t > SUBL and bytes_fn(t) > budget:
        t = _round_up(t // 2, SUBL)
    return t


def _grow_tile(base, cap, bytes_fn, budget):
    t = base
    while 2 * t <= cap and bytes_fn(2 * t) <= budget:
        t *= 2
    return t


def _mosaic_params(semantics, need_bytes, vmem_cap):
    # need <= vmem_cap // 4 by construction, so the cap never clips below need.
    limit = min(max(int(need_bytes * 2), need_bytes + (4 << 20)), vmem_cap // 2)
    return pltpu.CompilerParams(dimension_semantics=semantics,
                                vmem_limit_bytes=limit)


# ----------------------------- Pallas kernels -------------------------------

def matmul_stats_kernel(p_ref, w_ref, g_ref, b_ref, y_ref, ss_ref,
                        sum_ref, sq_ref, *, inv_m):
    """Pass 1: conv-as-matmul + per-channel sum/sumsq; fold BN affine at end.

    Grid = (Cout tiles ["parallel"], M tiles ["arbitrary"]).
    """
    im = pl.program_id(1)

    @pl.when(im == 0)
    def _init():
        sum_ref[...] = jnp.zeros_like(sum_ref)
        sq_ref[...] = jnp.zeros_like(sq_ref)

    y = jnp.dot(p_ref[...], w_ref[...], preferred_element_type=jnp.float32)
    y_ref[...] = y.astype(y_ref.dtype)            # bf16 writeback: half the bytes
    sum_ref[...] += jnp.sum(y, axis=0, keepdims=True)        # stats from f32 y
    sq_ref[...] += jnp.sum(y * y, axis=0, keepdims=True)

    @pl.when(im == pl.num_programs(1) - 1)
    def _finalize():
        # TODO(synk): for very large M (e.g. 256*56*56) switch to a mean-shifted
        # / Welford-style combine; E[y^2]-E[y]^2 in f32 can lose precision.
        mu = sum_ref[...] * inv_m
        var = jnp.maximum(sq_ref[...] * inv_m - mu * mu, 0.0)
        scale = g_ref[...] * lax.rsqrt(var + EPS)             # rsqrt -> EUP slot
        shift = b_ref[...] - mu * scale
        ss_ref[0:1, :] = scale
        ss_ref[1:2, :] = shift


def bn_add_bn_relu_kernel(y_ref, ss_ref, r_ref, ssr_ref, o_ref):
    """Pass 2 (conv2 + conv1x1 shortcut): two BN affines + add + ReLU."""
    y = y_ref[...].astype(jnp.float32) * ss_ref[0:1, :] + ss_ref[1:2, :]
    r = r_ref[...].astype(jnp.float32) * ssr_ref[0:1, :] + ssr_ref[1:2, :]
    o_ref[...] = jnp.maximum(y + r, 0.0).astype(o_ref.dtype)


def bn_add_relu_kernel(y_ref, ss_ref, r_ref, o_ref):
    """Pass 2 (conv2 + identity residual): BN affine + add + ReLU."""
    y = y_ref[...].astype(jnp.float32) * ss_ref[0:1, :] + ss_ref[1:2, :]
    o_ref[...] = jnp.maximum(y + r_ref[...].astype(jnp.float32),
                             0.0).astype(o_ref.dtype)


# ----------------------------- pallas_call wrappers -------------------------

def _conv_stats(patches, weight, gamma, beta, m_real, tile_m, ct, vmem_cap):
    """patches (M_pad,Kp) bf16, weight (Kp,Cp) bf16, gamma/beta (1,Cp) f32.
    Returns conv output y (M_pad,Cp) bf16 and folded (scale,shift) (2,Cp) f32."""
    m_pad, kp = patches.shape
    cp = weight.shape[1]
    grid = (cp // ct, m_pad // tile_m)            # (Cout tiles, M tiles)
    kernel = functools.partial(matmul_stats_kernel, inv_m=1.0 / float(m_real))
    need = _conv_tile_bytes(tile_m, kp, ct)
    y, ss = pl.pallas_call(
        kernel,
        grid=grid,
        in_specs=[
            pl.BlockSpec((tile_m, kp), lambda jc, im: (im, 0)),   # patch tile
            pl.BlockSpec((kp, ct), lambda jc, im: (0, jc)),       # weight (resident)
            pl.BlockSpec((1, ct), lambda jc, im: (0, jc)),        # gamma
            pl.BlockSpec((1, ct), lambda jc, im: (0, jc)),        # beta
        ],
        out_specs=(
            pl.BlockSpec((tile_m, ct), lambda jc, im: (im, jc)),  # raw conv out
            pl.BlockSpec((2, ct), lambda jc, im: (0, jc)),        # (scale, shift)
        ),
        out_shape=(
            jax.ShapeDtypeStruct((m_pad, cp), jnp.bfloat16),
            jax.ShapeDtypeStruct((2, cp), jnp.float32),
        ),
        scratch_shapes=[pltpu.VMEM((1, ct), jnp.float32),   # sum
                        pltpu.VMEM((1, ct), jnp.float32)],  # sum of squares
        compiler_params=_mosaic_params(("parallel", "arbitrary"), need, vmem_cap),
    )(patches, weight, gamma, beta)
    return y, ss


def _apply(kernel, tile_m, cp, out_dtype, vmem_cap, *args):
    """Pass 2: elementwise affine / add / ReLU sweep, parallel over M tiles."""
    m_pad = args[0].shape[0]
    grid = (m_pad // tile_m,)

    def spec_for(a):
        if a.shape[0] == m_pad:
            return pl.BlockSpec((tile_m, cp), lambda i: (i, 0))
        return pl.BlockSpec(a.shape, lambda i: (0, 0))      # small, resident

    n_big = sum(1 for a in args if a.shape[0] == m_pad) + 1  # + output
    need = _ew_tile_bytes(tile_m, cp, n_big)
    return pl.pallas_call(
        kernel,
        grid=grid,
        in_specs=[spec_for(a) for a in args],
        out_specs=pl.BlockSpec((tile_m, cp), lambda i: (i, 0)),
        out_shape=jax.ShapeDtypeStruct((m_pad, cp), out_dtype),
        compiler_params=_mosaic_params(("parallel",), need, vmem_cap),
    )(*args)


# ------------------------------ JAX glue -------------------------------------

def _im2col_3x3(x_nhwc, stride):
    """3x3, pad=1, given stride. Returns (N*Ho*Wo, 9*C) patches, (N, Ho, Wo)."""
    n, h, w, c = x_nhwc.shape
    xp = jnp.pad(x_nhwc, ((0, 0), (1, 1), (1, 1), (0, 0)))
    ho = (h - 1) // stride + 1
    wo = (w - 1) // stride + 1
    cols = []
    for kh in range(3):
        for kw in range(3):
            cols.append(xp[:,
                           kh:kh + stride * (ho - 1) + 1:stride,
                           kw:kw + stride * (wo - 1) + 1:stride, :])
    p = jnp.concatenate(cols, axis=-1)           # (N, Ho, Wo, 9*C), bf16
    # TODO(synk): patches are still materialized in HBM (bf16); next step is
    # in-kernel 9-tap accumulation over haloed NHWC tiles (memory_space=pl.ANY
    # + make_async_copy) to eliminate the ~9x activation read/write.
    return p.reshape(n * ho * wo, 9 * c), (n, ho, wo)


def residual_block_forward(x_nhwc, params, stride, has_shortcut,
                           max_tile_m=1024, out_dtype=jnp.float32):
    """Pallas implementation of ResidualBlock.forward (NHWC, training-mode BN)."""
    n, _hin, _win, cin = x_nhwc.shape
    cout = params["w1"].shape[-1]
    cp = _round_up(cout, LANE)                       # lane-dense channel dim
    # Split Cout over a leading "parallel" grid axis on wide layers so a second
    # TensorCore (v7x) gets work and the resident weight per TC halves.
    ct = 256 if (cp > 256 and cp % 256 == 0) else cp

    vmem_cap = _vmem_capacity()
    budget = vmem_cap // 4     # tile budget: ~32 MiB on v5e/v6e, ~16 MiB on v7x

    # bf16 activations before any im2col / pad: halves all patch-build traffic.
    x_bf = x_nhwc.astype(jnp.bfloat16)

    # ---- im2col for conv1 + per-conv tile sizes ------------------------------
    p1, (n, ho, wo) = _im2col_3x3(x_bf, stride)
    m = n * ho * wo
    k1p = _round_up(9 * cin, LANE)
    k2p = _round_up(9 * cout, LANE)
    krp = _round_up(cin, LANE)

    cap = max(SUBL, _round_up(min(max_tile_m, m), SUBL))
    t2 = _shrink_tile(cap, lambda t: _conv_tile_bytes(t, k2p, ct), budget)
    t1 = _grow_tile(t2, cap, lambda t: _conv_tile_bytes(t, k1p, ct), budget)
    tr = (_grow_tile(t2, cap, lambda t: _conv_tile_bytes(t, krp, ct), budget)
          if has_shortcut else t2)
    te = _grow_tile(t2, cap, lambda t: _ew_tile_bytes(t, cp, 3), budget)
    m_pad = _round_up(m, max(t1, t2, tr, te))    # all tiles = t2 * 2^k -> divide

    # ---- conv1 (3x3, stride) + BN1 statistics --------------------------------
    p1 = _pad2d(p1, m_pad, k1p)                                  # bf16 already
    w1 = _pad2d(params["w1"].reshape(9 * cin, cout), k1p, cp, jnp.bfloat16)
    g1 = _pad2d(params["g1"], 1, cp)
    b1 = _pad2d(params["b1"], 1, cp)
    y1, ss1 = _conv_stats(p1, w1, g1, b1, m, t1, ct, vmem_cap)

    # ---- BN1 affine + ReLU fused into conv2's patch build (no h1 round trip) -
    # Lazy XLA elementwise expression so the spatial zero-padding of the 3x3
    # im2col is applied AFTER the affine+ReLU (as the module requires); XLA
    # fuses it into the patch-building fusion, so y1 is read exactly once.
    y1_img = y1[:m, :cout].reshape(n, ho, wo, cout)
    h1 = jnp.maximum(y1_img.astype(jnp.float32) * ss1[0, :cout] + ss1[1, :cout],
                     0.0).astype(jnp.bfloat16)

    # ---- conv2 (3x3, stride 1) + BN2 statistics -------------------------------
    p2, _ = _im2col_3x3(h1, 1)
    p2 = _pad2d(p2, m_pad, k2p)
    w2 = _pad2d(params["w2"].reshape(9 * cout, cout), k2p, cp, jnp.bfloat16)
    g2 = _pad2d(params["g2"], 1, cp)
    b2 = _pad2d(params["b2"], 1, cp)
    y2, ss2 = _conv_stats(p2, w2, g2, b2, m, t2, ct, vmem_cap)

    # ---- residual path + fused BN2-affine / add / ReLU ------------------------
    if has_shortcut:
        # shortcut = conv1x1(stride) + BN; 1x1 stride-s patches are x[::s, ::s]
        pr = _pad2d(x_bf[:, ::stride, ::stride, :].reshape(m, cin), m_pad, krp)
        wr = _pad2d(params["wr"].reshape(cin, cout), krp, cp, jnp.bfloat16)
        gr = _pad2d(params["gr"], 1, cp)
        br = _pad2d(params["br"], 1, cp)
        yr, ssr = _conv_stats(pr, wr, gr, br, m, tr, ct, vmem_cap)
        out = _apply(bn_add_bn_relu_kernel, te, cp, out_dtype, vmem_cap,
                     y2, ss2, yr, ssr)
    else:
        # identity residual (stride == 1, cin == cout)
        r = _pad2d(x_bf.reshape(m, cin), m_pad, cp)
        out = _apply(bn_add_relu_kernel, te, cp, out_dtype, vmem_cap,
                     y2, ss2, r)

    # TODO(synk): running_mean/running_var momentum updates (stateful BN side
    # effects) are not emitted; only the forward activations are produced.
    if m_pad == m and cp == cout:
        return out.reshape(n, ho, wo, cout)      # no padding -> no slice copy
    return out[:m, :cout].reshape(n, ho, wo, cout)


# --------------------------- pure-JAX reference -------------------------------
# Reference uses the same matmul precision policy as the kernels (bf16 inputs,
# f32 accumulation); BN / ReLU / add stay f32, matching the module semantics.

def _conv_ref(x, w, stride, pad):
    return lax.conv_general_dilated(
        x.astype(jnp.bfloat16), w.astype(jnp.bfloat16),
        window_strides=(stride, stride),
        padding=((pad, pad), (pad, pad)),
        dimension_numbers=("NHWC", "HWIO", "NHWC"),
        preferred_element_type=jnp.float32)


def _bn_ref(y, gamma, beta):
    mu = jnp.mean(y, axis=(0, 1, 2), keepdims=True)
    var = jnp.mean((y - mu) ** 2, axis=(0, 1, 2), keepdims=True)
    return ((y - mu) / jnp.sqrt(var + EPS)
            * gamma.reshape(1, 1, 1, -1) + beta.reshape(1, 1, 1, -1))


def residual_block_ref(x, params, stride, has_shortcut):
    y = jnp.maximum(_bn_ref(_conv_ref(x, params["w1"], stride, 1),
                            params["g1"], params["b1"]), 0.0)
    y = _bn_ref(_conv_ref(y, params["w2"], 1, 1), params["g2"], params["b2"])
    if has_shortcut:
        r = _bn_ref(_conv_ref(x, params["wr"], stride, 0),
                    params["gr"], params["br"])
    else:
        r = x
    return jnp.maximum(y + r, 0.0)


# ------------------------------ parameters ------------------------------------

def init_block_params(key, cin, cout, has_shortcut):
    ks = jax.random.split(key, 9)
    f32 = jnp.float32
    p = {
        "w1": jax.random.normal(ks[0], (3, 3, cin, cout), f32) / (3.0 * cin ** 0.5),
        "g1": 1.0 + 0.1 * jax.random.normal(ks[1], (1, cout), f32),
        "b1": 0.1 * jax.random.normal(ks[2], (1, cout), f32),
        "w2": jax.random.normal(ks[3], (3, 3, cout, cout), f32) / (3.0 * cout ** 0.5),
        "g2": 1.0 + 0.1 * jax.random.normal(ks[4], (1, cout), f32),
        "b2": 0.1 * jax.random.normal(ks[5], (1, cout), f32),
    }
    if has_shortcut:
        p["wr"] = jax.random.normal(ks[6], (1, 1, cin, cout), f32) / (cin ** 0.5)
        p["gr"] = 1.0 + 0.1 * jax.random.normal(ks[7], (1, cout), f32)
        p["br"] = 0.1 * jax.random.normal(ks[8], (1, cout), f32)
    return p


# --------------------------------- main ---------------------------------------

if __name__ == "__main__":
    key = jax.random.PRNGKey(0)
    kx, k1, k2 = jax.random.split(key, 3)

    # Small synthetic shapes consistent with the module (NCHW like PyTorch).
    x_nchw = jax.random.normal(kx, (2, 4, 16, 16), jnp.float32)
    x = jnp.transpose(x_nchw, (0, 2, 3, 1))  # -> NHWC

    # Mimic the start of a ResNet layer: downsampling block with 1x1 shortcut,
    # followed by an identity-shortcut block (as in _make_layer).
    params1 = init_block_params(k1, cin=4, cout=8, has_shortcut=True)
    params2 = init_block_params(k2, cin=8, cout=8, has_shortcut=False)

    # max_tile_m=32 forces a 4-step M grid at these toy shapes so the
    # multi-tile stats accumulation / pipelining path is exercised.
    # (Production shapes use the default 1024-row cap, bounded by VMEM budget.)
    # Block 1's output is emitted in bf16 since it only feeds block 2's bf16
    # patch pipeline; the final block emits f32.
    y = residual_block_forward(x, params1, stride=2, has_shortcut=True,
                               max_tile_m=32, out_dtype=jnp.bfloat16)
    y = residual_block_forward(y, params2, stride=1, has_shortcut=False,
                               max_tile_m=32)
    y = jax.block_until_ready(y)

    y_ref = residual_block_ref(x, params1, 2, True)
    y_ref = residual_block_ref(y_ref, params2, 1, False)

    assert y.shape == (2, 8, 8, 8), y.shape
    # bf16 conv outputs / bf16 inter-block activations (per the perf review)
    # give ~1-2e-2 max deviation vs the f32-BN reference at these shapes.
    if not jnp.allclose(y, y_ref, atol=4e-2, rtol=4e-2):
        max_err = float(jnp.max(jnp.abs(y - y_ref)))
        raise AssertionError(f"Pallas output mismatch, max abs err = {max_err}")

    print("KERNEL_OK")
</pallas_src>

<mosaic_0001>
module attributes {stable_mosaic.version = 11 : i64} {
  func.func @matmul_stats_kernel(%arg0: i32, %arg1: i32, %arg2: memref<32x128xbf16, #tpu.memory_space<vmem>>, %arg3: memref<128x128xbf16, #tpu.memory_space<vmem>>, %arg4: memref<1x128xf32, #tpu.memory_space<vmem>>, %arg5: memref<1x128xf32, #tpu.memory_space<vmem>>, %arg6: memref<32x128xbf16, #tpu.memory_space<vmem>>, %arg7: memref<2x128xf32, #tpu.memory_space<vmem>>, %arg8: memref<1x128xf32, #tpu.memory_space<vmem>>, %arg9: memref<1x128xf32, #tpu.memory_space<vmem>>) attributes {dimension_semantics = [#tpu.dimension_semantics<parallel>, #tpu.dimension_semantics<arbitrary>], iteration_bounds = array<i64: 1, 4>, scalar_prefetch = 0 : i64, scratch_operands = 2 : i64, tpu.core_type = #tpu.core_type<tc>, window_params = [{transform_indices = @transform_0, window_bounds = array<i64: 32, 128>}, {transform_indices = @transform_1, window_bounds = array<i64: 128, 128>}, {transform_indices = @transform_2, window_bounds = array<i64: 1, 128>}, {transform_indices = @transform_3, window_bounds = array<i64: 1, 128>}, {transform_indices = @transform_4, window_bounds = array<i64: 32, 128>}, {transform_indices = @transform_5, window_bounds = array<i64: 2, 128>}]} {
    %c0_i32 = arith.constant 0 : i32
    %0 = arith.cmpi eq, %arg1, %c0_i32 : i32
    %1 = arith.extui %0 : i1 to i32
    %c0_i32_0 = arith.constant 0 : i32
    %2 = arith.cmpi ne, %1, %c0_i32_0 : i32
    scf.if %2 {
      %cst_17 = arith.constant 0.000000e+00 : f32
      %22 = vector.broadcast %cst_17 : f32 to vector<1x128xf32>
      %c0_18 = arith.constant 0 : index
      %c0_19 = arith.constant 0 : index
      %23 = vector.load %arg8[%c0_18, %c0_19] : memref<1x128xf32, #tpu.memory_space<vmem>>, vector<1x128xf32>
      tpu.vector_store %arg8[%c0_18, %c0_19], %22 {strides = array<i32>} : memref<1x128xf32, #tpu.memory_space<vmem>>, vector<1x128xf32>,
      %cst_20 = arith.constant 0.000000e+00 : f32
      %24 = vector.broadcast %cst_20 : f32 to vector<1x128xf32>
      %c0_21 = arith.constant 0 : index
      %c0_22 = arith.constant 0 : index
      %25 = vector.load %arg9[%c0_21, %c0_22] : memref<1x128xf32, #tpu.memory_space<vmem>>, vector<1x128xf32>
      tpu.vector_store %arg9[%c0_21, %c0_22], %24 {strides = array<i32>} : memref<1x128xf32, #tpu.memory_space<vmem>>, vector<1x128xf32>,
    } else {
    }
    %c0 = arith.constant 0 : index
    %c0_1 = arith.constant 0 : index
    %3 = vector.load %arg2[%c0, %c0_1] : memref<32x128xbf16, #tpu.memory_space<vmem>>, vector<32x128xbf16>
    %c0_2 = arith.constant 0 : index
    %c0_3 = arith.constant 0 : index
    %4 = vector.load %arg3[%c0_2, %c0_3] : memref<128x128xbf16, #tpu.memory_space<vmem>>, vector<128x128xbf16>
    %cst = arith.constant dense<0.000000e+00> : vector<32x128xf32>
    %5 = tpu.matmul %3, %4, %cst {dimension_numbers = #tpu.dot_dimension_numbers<[1], [0], [0], [1], [0, 0, 1, 1], [], []>} : vector<32x128xbf16>, vector<128x128xbf16>, vector<32x128xf32> -> vector<32x128xf32>
    %6 = arith.truncf %5 : vector<32x128xf32> to vector<32x128xbf16>
    %c0_4 = arith.constant 0 : index
    %c0_5 = arith.constant 0 : index
    %7 = vector.load %arg6[%c0_4, %c0_5] : memref<32x128xbf16, #tpu.memory_space<vmem>>, vector<32x128xbf16>
    tpu.vector_store %arg6[%c0_4, %c0_5], %6 {strides = array<i32>} : memref<32x128xbf16, #tpu.memory_space<vmem>>, vector<32x128xbf16>,
    %c0_6 = arith.constant 0 : index
    %c0_7 = arith.constant 0 : index
    %8 = vector.load %arg8[%c0_6, %c0_7] : memref<1x128xf32, #tpu.memory_space<vmem>>, vector<1x128xf32>
    %cst_8 = arith.constant dense<0.000000e+00> : vector<128xf32>
    %9 = vector.multi_reduction <add>, %5, %cst_8 [0] : vector<32x128xf32> to vector<128xf32>
    %10 = vector.shape_cast %9 : vector<128xf32> to vector<1x128xf32>
    %11 = arith.addf %8, %10 : vector<1x128xf32>
    %c0_9 = arith.constant 0 : index
    %c0_10 = arith.constant 0 : index
    %12 = vector.load %arg8[%c0_9, %c0_10] : memref<1x128xf32, #tpu.memory_space<vmem>>, vector<1x128xf32>
    tpu.vector_store %arg8[%c0_9, %c0_10], %11 {strides = array<i32>} : memref<1x128xf32, #tpu.memory_space<vmem>>, vector<1x128xf32>,
    %c0_11 = arith.constant 0 : index
    %c0_12 = arith.constant 0 : index
    %13 = vector.load %arg9[%c0_11, %c0_12] : memref<1x128xf32, #tpu.memory_space<vmem>>, vector<1x128xf32>
    %14 = arith.mulf %5, %5 : vector<32x128xf32>
    %cst_13 = arith.constant dense<0.000000e+00> : vector<128xf32>
    %15 = vector.multi_reduction <add>, %14, %cst_13 [0] : vector<32x128xf32> to vector<128xf32>
    %16 = vector.shape_cast %15 : vector<128xf32> to vector<1x128xf32>
    %17 = arith.addf %13, %16 : vector<1x128xf32>
    %c0_14 = arith.constant 0 : index
    %c0_15 = arith.constant 0 : index
    %18 = vector.load %arg9[%c0_14, %c0_15] : memref<1x128xf32, #tpu.memory_space<vmem>>, vector<1x128xf32>
    tpu.vector_store %arg9[%c0_14, %c0_15], %17 {strides = array<i32>} : memref<1x128xf32, #tpu.memory_space<vmem>>, vector<1x128xf32>,
    %c3_i32 = arith.constant 3 : i32
    %19 = arith.cmpi eq, %arg1, %c3_i32 : i32
    %20 = arith.extui %19 : i1 to i32
    %c0_i32_16 = arith.constant 0 : i32
    %21 = arith.cmpi ne, %20, %c0_i32_16 : i32
    scf.if %21 {
      %c0_17 = arith.constant 0 : index
      %c0_18 = arith.constant 0 : index
      %22 = vector.load %arg8[%c0_17, %c0_18] : memref<1x128xf32, #tpu.memory_space<vmem>>, vector<1x128xf32>
      %cst_19 = arith.constant 7.812500e-03 : f32
      %23 = vector.broadcast %cst_19 : f32 to vector<1x128xf32>
      %24 = arith.mulf %22, %23 : vector<1x128xf32>
      %c0_20 = arith.constant 0 : index
      %c0_21 = arith.constant 0 : index
      %25 = vector.load %arg9[%c0_20, %c0_21] : memref<1x128xf32, #tpu.memory_space<vmem>>, vector<1x128xf32>
      %cst_22 = arith.constant 7.812500e-03 : f32
      %26 = vector.broadcast %cst_22 : f32 to vector<1x128xf32>
      %27 = arith.mulf %25, %26 : vector<1x128xf32>
      %28 = arith.mulf %24, %24 : vector<1x128xf32>
      %29 = arith.subf %27, %28 : vector<1x128xf32>
      %cst_23 = arith.constant 0.000000e+00 : f32
      %30 = vector.broadcast %cst_23 : f32 to vector<1x128xf32>
      %31 = arith.maximumf %29, %30 : vector<1x128xf32>
      %c0_24 = arith.constant 0 : index
      %c0_25 = arith.constant 0 : index
      %32 = vector.load %arg4[%c0_24, %c0_25] : memref<1x128xf32, #tpu.memory_space<vmem>>, vector<1x128xf32>
      %cst_26 = arith.constant 9.99999974E-6 : f32
      %33 = vector.broadcast %cst_26 : f32 to vector<1x128xf32>
      %34 = arith.addf %31, %33 : vector<1x128xf32>
      %35 = math.rsqrt %34 : vector<1x128xf32>
      %36 = arith.mulf %32, %35 : vector<1x128xf32>
      %c0_27 = arith.constant 0 : index
      %c0_28 = arith.constant 0 : index
      %37 = vector.load %arg5[%c0_27, %c0_28] : memref<1x128xf32, #tpu.memory_space<vmem>>, vector<1x128xf32>
      %38 = arith.mulf %24, %36 : vector<1x128xf32>
      %39 = arith.subf %37, %38 : vector<1x128xf32>
      %c0_29 = arith.constant 0 : index
      %c0_30 = arith.constant 0 : index
      %40 = vector.load %arg7[%c0_29, %c0_30] : memref<2x128xf32, #tpu.memory_space<vmem>>, vector<1x128xf32>
      tpu.vector_store %arg7[%c0_29, %c0_30], %36 {strides = array<i32>} : memref<2x128xf32, #tpu.memory_space<vmem>>, vector<1x128xf32>,
      %c1 = arith.constant 1 : index
      %c0_31 = arith.constant 0 : index
      %41 = vector.load %arg7[%c1, %c0_31] : memref<2x128xf32, #tpu.memory_space<vmem>>, vector<1x128xf32>
      tpu.vector_store %arg7[%c1, %c0_31], %39 {strides = array<i32>} : memref<2x128xf32, #tpu.memory_space<vmem>>, vector<1x128xf32>,
    } else {
    }
    return
  }
  func.func @transform_0(%arg0: i32, %arg1: i32) -> (i32, i32) {
    %c0_i32 = arith.constant 0 : i32
    %c0_i32_0 = arith.constant 0 : i32
    return %arg1, %c0_i32 : i32, i32
  }
  func.func @transform_1(%arg0: i32, %arg1: i32) -> (i32, i32) {
    %c0_i32 = arith.constant 0 : i32
    %c0_i32_0 = arith.constant 0 : i32
    return %c0_i32, %arg0 : i32, i32
  }
  func.func @transform_2(%arg0: i32, %arg1: i32) -> (i32, i32) {
    %c0_i32 = arith.constant 0 : i32
    %c0_i32_0 = arith.constant 0 : i32
    return %c0_i32, %arg0 : i32, i32
  }
  func.func @transform_3(%arg0: i32, %arg1: i32) -> (i32, i32) {
    %c0_i32 = arith.constant 0 : i32
    %c0_i32_0 = arith.constant 0 : i32
    return %c0_i32, %arg0 : i32, i32
  }
  func.func @transform_4(%arg0: i32, %arg1: i32) -> (i32, i32) {
    %c0_i32 = arith.constant 0 : i32
    return %arg1, %arg0 : i32, i32
  }
  func.func @transform_5(%arg0: i32, %arg1: i32) -> (i32, i32) {
    %c0_i32 = arith.constant 0 : i32
    %c0_i32_0 = arith.constant 0 : i32
    return %c0_i32, %arg0 : i32, i32
  }
}

</mosaic_0001>

<bundles_post_ra>
// kernel: tpu_custom_call.1
= control target key start
LH: loop header
LB: loop body
LE: loop exit
PB: predicated region body
PF: predicated region fallthrough
CT: control target
= control target key end

     0   :  { %11 = vsyncpa [#allocation5], 0  ;;  %s1335_s0 = inlined_call_operand.hbm [shape: bf16[128,128], index: 0, kind: input, shape index: {}]   ;;  %s1336_s1 = inlined_call_operand.hbm [shape: bf16[128,128], index: 1, kind: input, shape index: {}]   ;;  %s1337_s2 = inlined_call_operand.vmem [shape: f32[1,128], index: 2, kind: input, shape index: {}]   ;;  %s1338_s3 = inlined_call_operand.vmem [shape: f32[1,128], index: 3, kind: input, shape index: {}]   ;;  %s1339_s4 = inlined_call_operand.hbm [shape: bf16[128,128], index: 4, kind: output, shape index: {0}]   ;;  %s1340_s5 = inlined_call_operand.hbm [shape: f32[2,128], index: 5, kind: output, shape index: {1}]  }
   0x1   :  { %13 = vsyncpa [#allocation5 + $0x1], 0 }
   0x2   :  { %14 = vsyncpa [#allocation8], 0 }
   0x3   :  { %15 = vsyncpa [#allocation6], 0 }
   0x4   :  { %17 = vsyncpa [#allocation6 + $0x1], 0 }
   0x5   :  { %18 = vsyncpa [#allocation11], 0  ;;  %s1073_s18 = smov 0   ;;  %s1075_s19 = smov 0  }
   0x6   :  { %s1077_s20 = smov 0   ;;  %s1079_s21 = smov 0  }
   0x7   :  { %s1081_s22 = smov 0   ;;  %s1083_s23 = smov 0  }
   0x8 LB: > { %s677_s24 = sadd.s32 4294967295, %s1032_s23   ;;  %s678_s25 = sadd.s32 4294967294, %s1032_s23   ;;  %s1032_s23 = sphi %s1083_s23, %s24_s23   ;;  %s1028_s22 = sphi %s1081_s22, %s1369_s22   ;;  %s1024_s21 = sphi %s1079_s21, %s1368_s21   ;;  %s1020_s20 = sphi %s1077_s20, %s1367_s20   ;;  %s1016_s19 = sphi %s1075_s19, %s1366_s19   ;;  %s1012_s18 = sphi %s1073_s18, %s1365_s18  }
   0x9   : > { %p56_p0 = scmp.ne.s32.totalorder %s1016_s19, %s1012_s18  ;;  %p1107_p1 = scmp.eq.s32.totalorder %s677_s24, 0 }
   0xa   : > { %p1111_p2 = scmp.eq.s32.totalorder %s677_s24, 3  ;;  %p166_p3 = scmp.eq.s32.totalorder %s678_s25, 3 }
   0xb   : > { %s1348_s26 = scalar_select %p1107_p1, 1, 0 }
   0xc   : > { %s1349_s27 = scalar_select %p1111_p2, 1, 0 }
   0xd   : > { %p1117_p4 = por %p1107_p1, %p56_p0  ;;  %p679_p5 = scmp.ge.s32.totalorder %s1032_s23, 1 }
   0xe   : > { %p1122_p6 = por %p166_p3, %p56_p0  ;;  %p199_p7 = scmp.lt.s32.totalorder %s1032_s23, 5 }
   0xf   : > { %s1350_s28 = scalar_select %p1117_p4, 1, 0 }
  0x10   : > { %s1351_s29 = scalar_select %p1122_p6, 1, 0 }
  0x11   : > { %p1127_p8 = pnand %p679_p5, %p199_p7  ;;  %s1034_s6 = smov [#allocation7]  }
  0x12   : > { %s213_s7 = sshll.u32 %s1034_s6, 4  ;;  %s33_s9 = sadd.s32 1, %s1028_s22  ;;  %s214_s7 = int_to_ptr.vmem [resolvable:$true] %s213_s7 }
  0x13   : > { %s1352_s30 = scalar_select %p1127_p8, 1, 0 }
  0x14   : > { %p773_p9 = pneg %p1127_p8  ;;  %s858_s12 = scalar_lea.hbm %s1336_s1, 1024 }
  0x15   : > { %p859_p11 = scmp.ne.s32.totalorder %s1336_s1, %s858_s12  ;;  %p865_p3 = scmp.lt.u32.totalorder %s858_s12, %s1336_s1 }
  0x16   : > { %p1135_p10 = pnand %p773_p9, %p1107_p1 }
  0x18   : > { %p860_p12 = pneg %p1135_p10 }
  0x1a   : > { %p861_p13 = pnand %p860_p12, %p859_p11 }
  0x1c   : > { %p862_p0 = pneg %p861_p13 }
  0x1e   : > { %p867_p5 = pnand %p865_p3, %p862_p0 }
  0x20   : > { %870 = shalt.err (!%p867_p5)
}
  0x21   : > { %s871_s17 = scalar_lea.vmem %s214_s7, 1024  ;;  %p879_p1 = scmp.lt.s32.totalorder %s214_s7, %s214_s7 }
  0x22   : > { %p872_p7 = scmp.ne.s32.totalorder %s214_s7, %s871_s17  ;;  %p880_p4 = scmp.lt.s32.totalorder %s871_s17, %s871_s17 }
  0x24   : > { %p874_p9 = pnand %p872_p7, %p860_p12  ;;  %p881_p8 = por %p880_p4, %p879_p1 }
  0x26   : > { %p875_p6 = pneg %p874_p9 }
  0x28   : > { %p882_p2 = pnand %p881_p8, %p875_p6 }
  0x2a   : > { %885 = shalt.err (!%p882_p2)
}
  0x2b   : > { %s1346_s24 = smov 64   ;;  %s1347_s25 = smov 4  }
  0x2c   : > { %776 = dma.hbm_to_vmem [thread:$0]  (!%p1135_p10), %s1336_s1, 1024, %s214_s7, [#allocation8], %s1346_s24, %s1346_s24, %s1347_s25  }
  0x2d   : > { %p34_p1 = scmp.ge.s32.totalorder %s33_s9, 4  ;;  %s43_s11 = sadd.s32 1, %s1020_s20 }
  0x2e   : > { %p50_p2 = scmp.ne.s32.totalorder %s1020_s20, %s1016_s19  ;;  %p51_p4 = scmp.eq.s32.totalorder %s1032_s23, 0 }
  0x2f   : > { %s1371_s9 = smov (%p34_p1, %s33_s9), 0  ;;  %p1355_p8 = scmp.ne.s32.totalorder %s1349_s27, 0 }
  0x30   : > { %p1165_p6 = por %p51_p4, %p50_p2  ;;  %s40_s13 = ssub.s32 %s1028_s22, %s1371_s9 }
  0x31   : > { %p1171_p11 = por %p1355_p8, %p50_p2  ;;  %p786_p12 = scmp.lt.s32.totalorder %s1032_s23, 4 }
  0x32   : > { %p41_p10 = scmp.eq.s32.totalorder %s40_s13, 0  ;;  %s239_s7 = sand.u32 1, %s1020_s20  }
  0x33   : > { %s684_s14 = sshll.u32 %s239_s7, 4  ;;  %s714_s16 = sshll.u32 %s1028_s22, 8 }
  0x34   : > { %s1180_s15 = scalar_select %p41_p10, %s1020_s20, %s43_s11  }
  0x35   : > { %s1186_s10 = scalar_lea.hbm %s1335_s0, %s714_s16  ;;  %s243_s24 = scalar_lea.vmem [#allocation4], %s684_s14 }
  0x36   : > { %s250_s25 = sshll.u32 %s243_s24, 4  ;;  %p1192_p13 = pnand %p786_p12, %p1165_p6  ;;  %s1188_s25 = int_to_ptr.vmem [resolvable:$true] %s250_s25 }
  0x37   : > { %s1196_s11 = scalar_lea.sflag [#allocation5], %s239_s7  ;;  %s886_s17 = scalar_lea.hbm %s1186_s10, 256 }
  0x38   : > { %p887_p0 = scmp.ne.s32.totalorder %s1186_s10, %s886_s17  ;;  %p888_p3 = pneg %p1192_p13 }
  0x39   : > { %s891_s12 = scalar_lea.hbm %s1335_s0, 1024  ;;  %p892_p9 = scmp.lt.u32.totalorder %s1186_s10, %s1335_s0 }
  0x3a   : > { %p889_p5 = pnand %p888_p3, %p887_p0  ;;  %p893_p1 = scmp.lt.u32.totalorder %s891_s12, %s886_s17 }
  0x3b   : > { %p895_p4 = scmp.lt.u32.totalorder %s886_s17, %s1186_s10 }
  0x3c   : > { %p890_p7 = pneg %p889_p5  ;;  %p894_p2 = por %p893_p1, %p892_p9 }
  0x3e   : > { %p896_p6 = por %p895_p4, %p894_p2 }
  0x40   : > { %p897_p8 = pnand %p896_p6, %p890_p7 }
  0x42   : > { %900 = shalt.err (!%p897_p8)
}
  0x43   : > { %s901_s7 = scalar_lea.vmem %s1188_s25, 256  ;;  %s1037_s24 = smov [#allocation4]  }
  0x44   : > { %p902_p12 = scmp.ne.s32.totalorder %s1188_s25, %s901_s7  ;;  %s906_s14 = sshll.u32 %s1037_s24, 4  ;;  %s907_s14 = int_to_ptr.vmem [resolvable:$false] %s906_s14 }
  0x45   : > { %s908_s16 = scalar_lea.vmem %s907_s14, 512  ;;  %p909_p5 = scmp.lt.s32.totalorder %s1188_s25, %s907_s14 }
  0x46   : > { %p904_p10 = pnand %p902_p12, %p888_p3  ;;  %p910_p9 = scmp.lt.s32.totalorder %s908_s16, %s901_s7 }
  0x48   : > { %p905_p0 = pneg %p904_p10  ;;  %p911_p1 = por %p910_p9, %p909_p5 }
  0x4a   : > { %p912_p2 = pnand %p911_p1, %p905_p0 }
  0x4c   : > { %915 = shalt.err (!%p912_p2)
}
  0x4d   : > { %s1358_s17 = smov 4   ;;  %s1359_s12 = smov 64  }
  0x4e   : > { %780 = dma.hbm_to_vmem [thread:$0]  (!%p1192_p13), %s1186_s10, 256, %s1188_s25, %s1196_s11, %s1359_s12, %s1359_s12, %s1358_s17  }
  0x4f   : > { %p1360_p3 = scmp.ne.s32.totalorder %s1352_s30, 0 }
  0x50   : > { %s1230_s6 = sand.u32 (!%p1360_p3), 1, %s1016_s19   ;;  %p1361_p7 = scmp.ne.s32.totalorder (!%p1360_p3), %s1350_s28, 0 }
  0x51   : > { %262 = sbr.rel (%p1360_p3) target bundleno = 455 (0x1c7), region = 36  ;;  %s688_s7 = sshll.u32 (!%p1360_p3), %s1230_s6, 4 }
  0x52   : > { %s265_s24 = scalar_lea.sflag (!%p1360_p3), [#allocation5], %s1230_s6  ;;  %s1234_s14 = scalar_lea.vmem (!%p1360_p3), [#allocation4], %s688_s7 }
  0x58   : > { %995 = dma.done.wait (%p1361_p7), %s265_s24, 256  }
  0x59   : > { %997 = vsyncadd (%p1361_p7), %s265_s24, 4294967040  ;;  %p1362_p13 = scmp.ne.s32.totalorder %s1348_s26, 0 }
  0x5b   : > { %999 = dma.done.wait (%p1362_p13), [#allocation8], 1024  }
  0x5c   : > { %1001 = vsyncadd (%p1362_p13), [#allocation8], 4294966272  ;;  %s1244_s30 = scalar_lea.vmem [#allocation9], %s688_s7  ;;  %p691_p4 = scmp.ne.s32.totalorder %s1024_s21, 0 }
  0x5d   : > { %v1038_v0 = vmov (!%p691_p4), 0.0  }
  0x5e   : > { %317 = sbr.rel (%p691_p4) target bundleno = 101 (0x65), region = 48  ;;  %318 = vst [vmem:[#allocation2] sm:$0x1] (!%p691_p4), %v1038_v0  ;;  %319 = vst [vmem:[#allocation3] sm:$0x1] (!%p691_p4), %v1038_v0 }
  0x65 PF: > { %v846_v1 = vld [vmem:[#allocation7] sm:$0xff]   ;;  %v847_v2 = vld [vmem:[#allocation7 + $0x8] sm:$0xff]   ;;  %v848_v3 = vld [vmem:[#allocation7 + $0x10] sm:$0xff]   ;;  %p706_p6 = scmp.ne.s32.totalorder %s1024_s21, 3 }
  0x66   : > { %741 = vmatprep.subr.bf16.mxu0 %v846_v1  ;;  %v849_v4 = vld [vmem:[#allocation7 + $0x18] sm:$0xff]   ;;  %v854_v5 = vld [vmem:[%s1234_s14] sm:$0xff]   ;;  %v851_v7 = vld [vmem:[#allocation7 + $0x28] sm:$0xff]  }
  0x67   : > { %742 = vmatpush3.bf16.msra.mxu0 %v846_v1  ;;  %757 = vmatprep.mubr.bf16.mxu0 %v854_v5  ;;  %v850_v6 = vld [vmem:[#allocation7 + $0x20] sm:$0xff]   ;;  %v852_v8 = vld [vmem:[#allocation7 + $0x30] sm:$0xff]   ;;  %v853_v9 = vld [vmem:[#allocation7 + $0x38] sm:$0xff]  }
  0x68   : > { %743 = vmatprep.subr.bf16.mxu0 %v847_v2  ;;  %v855_v10 = vld [vmem:[%s1234_s14 + $0x8] sm:$0xff]  }
  0x69   : > { %v469_v36 = vld [vmem:[#allocation2] sm:$0x1]  ;;  %v481_v39 = vld [vmem:[#allocation3] sm:$0x1] }
  0x6a   : > { %v508_v51 = vld [vmem:[%s1337_s2] sm:$0x1] (!%p706_p6) }
  0x6b   : > { %744 = vmatpush3.bf16.msra.mxu0 %v847_v2  ;;  %v512_v54 = vld [vmem:[%s1338_s3] sm:$0x1] (!%p706_p6) }
  0x6c   : > { %745 = vmatprep.subr.bf16.mxu0 %v848_v3 }
  0x6f   : > { %746 = vmatpush3.bf16.msra.mxu0 %v848_v3 }
  0x70   : > { %747 = vmatprep.subr.bf16.mxu0 %v849_v4 }
  0x73   : > { %748 = vmatpush3.bf16.msra.mxu0 %v849_v4 }
  0x74   : > { %749 = vmatprep.subr.bf16.mxu0 %v850_v6 }
  0x77   : > { %750 = vmatpush3.bf16.msra.mxu0 %v850_v6 }
  0x78   : > { %751 = vmatprep.subr.bf16.mxu0 %v851_v7 }
  0x7b   : > { %752 = vmatpush3.bf16.msra.mxu0 %v851_v7 }
  0x7c   : > { %753 = vmatprep.subr.bf16.mxu0 %v852_v8 }
  0x7f   : > { %754 = vmatpush3.bf16.msra.mxu0 %v852_v8 }
  0x80   : > { %755 = vmatprep.subr.bf16.mxu0 %v853_v9 }
  0x83   : > { %756 = vmatpush3.bf16.msra.mxu0 %v853_v9 }
  0x86   : > { %758 = vmatmul.mubr.bf16.vlgmr.msra.gmra.mrb[0].mxu0 %v855_v10 }
 0x159   : > { %v759_v11 = vpop.f32.mrb[0].mxu0 }
 0x15a   : > { %v434_v12 = vpop.f32.mrb[1].mxu0  ;;  %v484_v20 = vmul.f32 %v759_v11, %v759_v11 }
 0x15b   : > { %v760_v13 = vpop.f32.mrb[2].mxu0  ;;  %v482_v16 = vmul.f32 %v434_v12, %v434_v12 }
 0x15c   : > { %v728_v14 = vpack.c.bf16 %v760_v13, %v759_v11  ;;  %v437_v15 = vpop.f32.mrb[3].mxu0  ;;  %v485_v23 = vmul.f32 %v760_v13, %v760_v13 }
 0x15d   : > { %v723_v17 = vpack.c.bf16 %v437_v15, %v434_v12  ;;  %v470_v18 = vadd.f32 %v437_v15, %v434_v12  ;;  %v483_v19 = vmul.f32 %v437_v15, %v437_v15 }
 0x15e   : > { %730 = vst [vmem:[%s1244_s30 + $0x8] sm:$0xff] %v728_v14  }
 0x15f   : > { %724 = vst [vmem:[%s1244_s30] sm:$0xff] %v723_v17   ;;  %v471_v21 = vadd.f32 %v759_v11, %v470_v18  ;;  %v486_v22 = vadd.f32 %v483_v19, %v482_v16 }
 0x161   : > { %v472_v24 = vadd.f32 %v760_v13, %v471_v21  ;;  %v487_v25 = vadd.f32 %v486_v22, %v484_v20 }
 0x163   : > { %v473_v26 = vrot.slane %v472_v24, 4  ;;  %v488_v27 = vadd.f32 %v487_v25, %v485_v23 }
 0x165   : > { %v474_v28 = vadd.f32 %v473_v26, %v472_v24  ;;  %v489_v29 = vrot.slane %v488_v27, 4 }
 0x167   : > { %v475_v30 = vrot.slane %v474_v28, 2  ;;  %v490_v31 = vadd.f32 %v489_v29, %v488_v27 }
 0x169   : > { %v476_v32 = vadd.f32 %v475_v30, %v474_v28  ;;  %v491_v33 = vrot.slane %v490_v31, 2 }
 0x16b   : > { %v477_v34 = vrot.slane %v476_v32, 1  ;;  %v492_v35 = vadd.f32 %v491_v33, %v490_v31 }
 0x16d   : > { %v478_v37 = vadd.f32 %v477_v34, %v476_v32  ;;  %v493_v38 = vrot.slane %v492_v35, 1  ;;  %500 = sbr.rel (%p706_p6) target bundleno = 405 (0x195), region = 52 }
 0x16f   : > { %v479_v40 = vadd.f32 %v478_v37, %v469_v36  ;;  %v494_v41 = vadd.f32 %v493_v38, %v492_v35 }
 0x171   : > { %480 = vst [vmem:[#allocation2] sm:$0x1] %v479_v40  ;;  %v495_v42 = vadd.f32 %v494_v41, %v481_v39 }
 0x173   : > { %496 = vst [vmem:[#allocation3] sm:$0x1] %v495_v42 }
 0x178   : > { %v501_v43 = vld [vmem:[#allocation2] sm:$0x1] }
 0x179   : > { %v502_v45 = vmul.f32 0.0078125, %v501_v43 }
 0x17a   : > { %v503_v44 = vld [vmem:[#allocation3] sm:$0x1] }
 0x17b   : > { %v504_v46 = vmul.f32 0.0078125, %v503_v44  ;;  %v505_v47 = vmul.f32 %v502_v45, %v502_v45 }
 0x17d   : > { %v506_v48 = vsub.f32 %v504_v46, %v505_v47 }
 0x17f   : > { %v507_v49 = vmax.f32 %v506_v48, 0.0 }
 0x181   : > { %v509_v50 = vadd.f32 1e-05, %v507_v49 }
 0x183   : > { %856 = vrsqrt.f32 %v509_v50 }
 0x18d   : > { %v857_v52 = vpop.eup %856 }
 0x18e   : > { %v511_v53 = vmul.f32 %v857_v52, %v508_v51 }
 0x190   : > { %515 = vst [vmem:[#allocation10] sm:$0x1] %v511_v53  ;;  %v513_v55 = vmul.f32 %v511_v53, %v502_v45 }
 0x192   : > { %v514_v56 = vsub.f32 %v512_v54, %v513_v55 }
 0x194   : > { %516 = vst [vmem:[#allocation10 + $0x1] sm:$0x1] %v514_v56 }
 0x195 PF: > { %s719_s13 = sshll.u32 %s1024_s21, 8  ;;  %s532_s12 = sshll.u32 %s1244_s30, 4  ;;  %s1265_s12 = int_to_ptr.vmem [resolvable:$true] %s532_s12 }
 0x196   : > { %s1262_s17 = scalar_lea.hbm %s1339_s4, %s719_s13  ;;  %s518_s7 = scalar_lea.sflag [#allocation6], %s1230_s6 }
 0x197   : > { %s916_s24 = scalar_lea.vmem %s1265_s12, 256  ;;  %s1039_s14 = smov [#allocation9]  }
 0x198   : > { %p917_p8 = scmp.ne.s32.totalorder %s1265_s12, %s916_s24  ;;  %s920_s26 = sshll.u32 %s1039_s14, 4  ;;  %s921_s26 = int_to_ptr.vmem [resolvable:$false] %s920_s26 }
 0x199   : > { %s922_s21 = scalar_lea.vmem %s921_s26, 512  ;;  %p923_p0 = scmp.lt.s32.totalorder %s1265_s12, %s921_s26 }
 0x19a   : > { %p918_p12 = pnand %p917_p8, %p1171_p11  ;;  %p924_p5 = scmp.lt.s32.totalorder %s922_s21, %s916_s24 }
 0x19c   : > { %p919_p10 = pneg %p918_p12  ;;  %p925_p9 = por %p924_p5, %p923_p0 }
 0x19e   : > { %p926_p1 = pnand %p925_p9, %p919_p10 }
 0x1a0   : > { %929 = shalt.err (!%p926_p1)
}
 0x1a1   : > { %s930_s30 = scalar_lea.hbm %s1262_s17, 256  ;;  %s934_s10 = scalar_lea.hbm %s1339_s4, 1024 }
 0x1a2   : > { %p931_p2 = scmp.ne.s32.totalorder %s1262_s17, %s930_s30  ;;  %p935_p13 = scmp.lt.u32.totalorder %s1262_s17, %s1339_s4 }
 0x1a3   : > { %p936_p4 = scmp.lt.u32.totalorder %s934_s10, %s930_s30  ;;  %p938_p8 = scmp.lt.u32.totalorder %s930_s30, %s1262_s17 }
 0x1a4   : > { %p932_p3 = pnand %p931_p2, %p1171_p11 }
 0x1a5   : > { %p937_p6 = por %p936_p4, %p935_p13 }
 0x1a6   : > { %p933_p7 = pneg %p932_p3 }
 0x1a7   : > { %p939_p12 = por %p938_p8, %p937_p6 }
 0x1a9   : > { %p940_p10 = pnand %p939_p12, %p933_p7 }
 0x1ab   : > { %943 = shalt.err (!%p940_p10)
}
 0x1ac   : > { %s1040_s16 = smov 64   ;;  %s1041_s24 = smov 4  }
 0x1ad   : > { %767 = dma.vmem_to_hbm [thread:$0]  (%p1171_p11), %s1265_s12, 256, %s1262_s17, %s518_s7, %s1040_s16, %s1040_s16, %s1041_s24  }
 0x1ae   : > { %s1042_s14 = smov [#allocation10]   ;;  %p1363_p5 = scmp.ne.s32.totalorder %s1349_s27, 0 }
 0x1af   : > { %s548_s26 = sshll.u32 %s1042_s14, 4  ;;  %s549_s26 = int_to_ptr.vmem [resolvable:$true] %s548_s26 }
 0x1b0   : > { %s944_s21 = scalar_lea.vmem %s549_s26, 32  ;;  %p951_p2 = scmp.lt.s32.totalorder %s549_s26, %s549_s26 }
 0x1b1   : > { %p945_p0 = scmp.ne.s32.totalorder %s549_s26, %s944_s21  ;;  %p952_p3 = scmp.lt.s32.totalorder %s944_s21, %s944_s21 }
 0x1b3   : > { %p946_p9 = pnand %p945_p0, %p1363_p5  ;;  %p953_p7 = por %p952_p3, %p951_p2 }
 0x1b5   : > { %p947_p1 = pneg %p946_p9 }
 0x1b7   : > { %p954_p13 = pnand %p953_p7, %p947_p1 }
 0x1b9   : > { %957 = shalt.err (!%p954_p13)
}
 0x1ba   : > { %s958_s8 = scalar_lea.hbm %s1340_s5, 32 }
 0x1bb   : > { %p959_p11 = scmp.ne.s32.totalorder %s1340_s5, %s958_s8  ;;  %p964_p8 = scmp.lt.u32.totalorder %s958_s8, %s1340_s5 }
 0x1bd   : > { %p960_p4 = pnand %p959_p11, %p1363_p5 }
 0x1bf   : > { %p961_p6 = pneg %p960_p4 }
 0x1c1   : > { %p966_p12 = pnand %p964_p8, %p961_p6 }
 0x1c3   : > { %969 = shalt.err (!%p966_p12)
}
 0x1c4   : > { %769 = dma.vmem_to_hbm [thread:$0]  (%p1363_p5), %s549_s26, 32, %s1340_s5, [#allocation11]  }
 0x1c5   : > { %1003 = dma.done.wait (%p1363_p5), [#allocation11], 32  }
 0x1c6   : > { %1005 = vsyncadd (%p1363_p5), [#allocation11], 4294967264 }
 0x1c7 PF: > { %p790_p10 = scmp.ge.s32.totalorder %s1032_s23, 2  ;;  %s564_s13 = sand.u32 1, %s1012_s18  }
 0x1c8   : > { %p1364_p0 = scmp.ne.s32.totalorder %s1351_s29, 0  ;;  %s565_s11 = scalar_lea.sflag [#allocation6], %s564_s13 }
 0x1ca   : > { %p782_p9 = pnand %p790_p10, %p1364_p0 }
 0x1cc   : > { %1007 = dma.done.wait (!%p782_p9), %s565_s11, 256  }
 0x1cd   : > { %1009 = vsyncadd (!%p782_p9), %s565_s11, 4294967040  ;;  %s24_s23 = sadd.s32 1, %s1032_s23   ;;  %s1365_s18 = smov %s1016_s19 }
 0x1ce   : > { %p21_p1 = scmp.ge.s32.totalorder %s24_s23, 6   ;;  %s1366_s19 = smov %s1020_s20 }
 0x1cf   : > { %s1367_s20 = smov %s1180_s15  ;;  %s1368_s21 = smov %s1028_s22 }
 0x1d0   : > { %s1369_s22 = smov %s1371_s9  ;;  %23 = sbr.rel (!%p21_p1) target bundleno = 8 (0x8), region = 109 }
 0x1d7   :  { %570 = vsyncpa [#allocation5], 1 }
 0x1d8   :  { %572 = vsyncpa [#allocation5 + $0x1], 1 }
 0x1d9   :  { %573 = vsyncpa [#allocation8], 1 }
 0x1da   :  { %574 = vsyncpa [#allocation6], 1 }
 0x1db   :  { %576 = vsyncpa [#allocation6 + $0x1], 1 }
 0x1dc   :  { %577 = vsyncpa [#allocation11], 1 }

</bundles_post_ra>
